<compile_context>
chip_gen: v7x
topology: tpu7x:2x2x1
jax: 0.10.0
libtpu: 0.0.40
codegen_flags: <defaults>
</compile_context>

<pallas_src>
import jax
import jax.numpy as jnp
from jax.experimental import pallas as pl
from jax.experimental.pallas import tpu as pltpu

EPS = 1e-5


def _make_kernel(L, Lo, stride, Cin, Ch, Co, has_downsample):
    """Build a BasicBlock1D kernel specialized for the given static config."""

    def tap(t):
        # rows t, t+stride, ... of the (L+2)-row padded input -> x[i*stride + t - 1]
        if stride == 1:
            return pl.ds(t, Lo)
        return pl.ds(t, Lo, stride=stride)

    def kernel(x_ref, w1_ref, s1_ref, b1_ref, w2_ref, s2_ref, b2_ref,
               out_ref, pat1_ref, h1pad_ref, pat2_ref):
        B = x_ref.shape[0]
        M = B * Lo

        # ---- conv1 (k=3, pad=1, stride) [+ fused 1x1 downsample] ----------
        # im2col: place the 3 shifted taps side-by-side in the lane dim.
        for t in range(3):
            pat1_ref[:, :, t * Cin:(t + 1) * Cin] = (
                x_ref[:, tap(t), :].astype(pat1_ref.dtype))
        z = jnp.dot(pat1_ref[...].reshape(M, 3 * Cin), w1_ref[...],
                    preferred_element_type=jnp.float32)            # (M, Ch[+Co])
        z = z * s1_ref[...] + b1_ref[...]                           # folded BN (f32)
        h1 = jnp.maximum(z[:, :Ch], 0.0)                            # ReLU on conv1 branch
        if has_downsample:
            r = z[:, Ch:]                                           # BN_d(1x1 conv) residual
        else:
            r = x_ref[:, pl.ds(1, L), :].reshape(M, Co)             # identity residual (f32)

        # ---- conv2 (k=3, pad=1, stride=1) ----------------------------------
        # Zero the two padding rows (cheap, megacore-safe), write the interior
        # once, then im2col the 3 taps into the second patch scratch.
        h1pad_ref[:, 0:1, :] = jnp.zeros((B, 1, Ch), h1pad_ref.dtype)
        h1pad_ref[:, Lo + 1:Lo + 2, :] = jnp.zeros((B, 1, Ch), h1pad_ref.dtype)
        h1pad_ref[:, 1:Lo + 1, :] = h1.reshape(B, Lo, Ch)
        for t in range(3):
            pat2_ref[:, :, t * Ch:(t + 1) * Ch] = (
                h1pad_ref[:, pl.ds(t, Lo), :].astype(pat2_ref.dtype))
        y = jnp.dot(pat2_ref[...].reshape(M, 3 * Ch), w2_ref[...],
                    preferred_element_type=jnp.float32)             # (M, Co)
        y = y * s2_ref[...] + b2_ref[...]

        out_ref[...] = jnp.maximum(y + r, 0.0).reshape(B, Lo, Co).astype(out_ref.dtype)

    return kernel


def basic_block_1d(x_nlc, params, stride):
    """BasicBlock1D forward.  x_nlc: (N, L, Cin) float32, channels-last."""
    N, L, Cin = x_nlc.shape
    Ch = params['w1_t'].shape[0]
    Co = params['w2_t'].shape[0]
    Lo = (L - 1) // stride + 1                    # k=3 pad=1 (matches k=1 pad=0)
    has_downsample = (stride != 1) or (Cin != Co)

    # Batch tile: largest divisor of N that keeps the grid length >= 2 (both
    # v7x TensorCores get work), capped at 32 to amortize per-step overhead.
    cap = max(1, min(32, N // 2))
    B_blk = 1
    for bb in range(cap, 0, -1):
        if N % bb == 0:
            B_blk = bb
            break
    grid = (N // B_blk,)

    # Conv padding applied once in the wrapper (keeps in-kernel slices simple).
    x_pad = jnp.pad(x_nlc.astype(jnp.float32), ((0, 0), (1, 1), (0, 0)))

    # im2col weights: row (t*Cin + c) of W1 is w1_t[:, c, t]  -> (3*Cin, Ch).
    W1 = jnp.transpose(params['w1_t'], (2, 1, 0)).reshape(3 * Cin, Ch)
    W2 = jnp.transpose(params['w2_t'], (2, 1, 0)).reshape(3 * Ch, Co)
    sc1 = params['sc1'].reshape(1, Ch).astype(jnp.float32)
    b1 = params['b1'].reshape(1, Ch).astype(jnp.float32)
    sc2 = params['sc2'].reshape(1, Co).astype(jnp.float32)
    b2 = params['b2'].reshape(1, Co).astype(jnp.float32)

    if has_downsample:
        # Fuse the 1x1-stride downsample into conv1's output columns: its weight
        # lives only on the center-tap rows of the im2col contraction dim.
        wd = jnp.transpose(params['wd_t'][:, :, 0], (1, 0))               # (Cin, Co)
        wd_rows = jnp.zeros((3 * Cin, Co), W1.dtype).at[Cin:2 * Cin, :].set(wd)
        W1 = jnp.concatenate([W1, wd_rows], axis=1)                        # (3*Cin, Ch+Co)
        sc1 = jnp.concatenate([sc1, params['scd'].reshape(1, Co).astype(jnp.float32)], axis=1)
        b1 = jnp.concatenate([b1, params['bd'].reshape(1, Co).astype(jnp.float32)], axis=1)
    Cw = W1.shape[1]

    W1 = W1.astype(jnp.bfloat16)
    W2 = W2.astype(jnp.bfloat16)

    kernel = _make_kernel(L, Lo, stride, Cin, Ch, Co, has_downsample)

    return pl.pallas_call(
        kernel,
        out_shape=jax.ShapeDtypeStruct((N, Lo, Co), jnp.float32),
        grid=grid,
        in_specs=[
            pl.BlockSpec((B_blk, L + 2, Cin), lambda g: (g, 0, 0)),   # padded x
            pl.BlockSpec((3 * Cin, Cw), lambda g: (0, 0)),            # conv1 (+dsamp) weight
            pl.BlockSpec((1, Cw), lambda g: (0, 0)),                  # BN1 (+BN_d) scale
            pl.BlockSpec((1, Cw), lambda g: (0, 0)),                  # BN1 (+BN_d) bias
            pl.BlockSpec((3 * Ch, Co), lambda g: (0, 0)),             # conv2 weight
            pl.BlockSpec((1, Co), lambda g: (0, 0)),                  # BN2 scale
            pl.BlockSpec((1, Co), lambda g: (0, 0)),                  # BN2 bias
        ],
        out_specs=pl.BlockSpec((B_blk, Lo, Co), lambda g: (g, 0, 0)),
        scratch_shapes=[
            pltpu.VMEM((B_blk, Lo, 3 * Cin), jnp.bfloat16),   # conv1 im2col patches
            pltpu.VMEM((B_blk, Lo + 2, Ch), jnp.float32),     # zero-padded conv1 output
            pltpu.VMEM((B_blk, Lo, 3 * Ch), jnp.bfloat16),    # conv2 im2col patches
        ],
        compiler_params=pltpu.CompilerParams(
            dimension_semantics=("parallel",)),
    )(x_pad, W1, sc1, b1, W2, sc2, b2)


def ref_forward(x_nlc, p, stride):
    """Pure-JAX reference (lax.conv) mirroring the PyTorch forward."""
    x = jnp.transpose(x_nlc, (0, 2, 1))  # NLC -> NCL

    def conv(z, w, s, pad):
        return jax.lax.conv_general_dilated(
            z, w, window_strides=(s,), padding=[(pad, pad)],
            dimension_numbers=('NCH', 'OIH', 'NCH'))

    def bn(z, scale, bias):
        return z * scale[None, :, None] + bias[None, :, None]

    h = jax.nn.relu(bn(conv(x, p['w1_t'], stride, 1), p['sc1'], p['b1']))
    y = bn(conv(h, p['w2_t'], 1, 1), p['sc2'], p['b2'])
    if 'wd_t' in p:
        r = bn(conv(x, p['wd_t'], stride, 0), p['scd'], p['bd'])
    else:
        r = x
    out = jax.nn.relu(y + r)
    return jnp.transpose(out, (0, 2, 1))  # back to NLC


def make_params(key, Cin, Ch, expansion, with_downsample):
    Co = Ch * expansion
    keys = jax.random.split(key, 6)

    def bn_fold(k, C):
        kg, kb, km, kv = jax.random.split(k, 4)
        gamma = jax.random.uniform(kg, (C,), minval=0.5, maxval=1.5)
        beta = 0.1 * jax.random.normal(kb, (C,))
        mean = 0.1 * jax.random.normal(km, (C,))
        var = jax.random.uniform(kv, (C,), minval=0.5, maxval=1.5)
        scale = gamma / jnp.sqrt(var + EPS)
        return scale.astype(jnp.float32), (beta - mean * scale).astype(jnp.float32)

    p = {}
    p['w1_t'] = (0.1 * jax.random.normal(keys[0], (Ch, Cin, 3))).astype(jnp.float32)
    p['sc1'], p['b1'] = bn_fold(keys[1], Ch)
    p['w2_t'] = (0.1 * jax.random.normal(keys[2], (Co, Ch, 3))).astype(jnp.float32)
    p['sc2'], p['b2'] = bn_fold(keys[3], Co)
    if with_downsample:
        p['wd_t'] = (0.1 * jax.random.normal(keys[4], (Co, Cin, 1))).astype(jnp.float32)
        p['scd'], p['bd'] = bn_fold(keys[5], Co)
    return p


if __name__ == "__main__":
    key = jax.random.PRNGKey(0)
    k_pa, k_pb, k_xa, k_xb = jax.random.split(key, 4)
    L = 16
    TOL = 3e-2  # matmul operands run in bf16 (f32 accumulation)

    # Case 1: BasicBlock1D(in=8, hidden=16, stride=2) -> fused 1x1-conv downsample path.
    N_a, Cin_a, Ch_a = 2, 8, 16
    pa = make_params(k_pa, Cin_a, Ch_a, expansion=1, with_downsample=True)
    x_ncl_a = jax.random.normal(k_xa, (N_a, Cin_a, L), dtype=jnp.float32)   # torch NCL
    xa = jnp.transpose(x_ncl_a, (0, 2, 1))                                   # -> NLC
    out_a = jax.block_until_ready(basic_block_1d(xa, pa, stride=2))
    ref_a = ref_forward(xa, pa, stride=2)
    assert out_a.shape == ref_a.shape, (out_a.shape, ref_a.shape)
    assert jnp.allclose(out_a, ref_a, atol=TOL, rtol=TOL), \
        float(jnp.max(jnp.abs(out_a - ref_a)))

    # Case 2: BasicBlock1D(in=16, hidden=16, stride=1) -> identity residual path (B_blk=2).
    N_b, Cin_b, Ch_b = 4, 16, 16
    pb = make_params(k_pb, Cin_b, Ch_b, expansion=1, with_downsample=False)
    x_ncl_b = jax.random.normal(k_xb, (N_b, Cin_b, L), dtype=jnp.float32)
    xb = jnp.transpose(x_ncl_b, (0, 2, 1))
    out_b = jax.block_until_ready(basic_block_1d(xb, pb, stride=1))
    ref_b = ref_forward(xb, pb, stride=1)
    assert out_b.shape == ref_b.shape, (out_b.shape, ref_b.shape)
    assert jnp.allclose(out_b, ref_b, atol=TOL, rtol=TOL), \
        float(jnp.max(jnp.abs(out_b - ref_b)))

    print("KERNEL_OK")
</pallas_src>

<mosaic_0001>
module attributes {stable_mosaic.version = 11 : i64} {
  func.func @kernel(%arg0: i32, %arg1: memref<1x18x8xf32, #tpu.memory_space<vmem>>, %arg2: memref<24x32xbf16, #tpu.memory_space<vmem>>, %arg3: memref<1x32xf32, #tpu.memory_space<vmem>>, %arg4: memref<1x32xf32, #tpu.memory_space<vmem>>, %arg5: memref<48x16xbf16, #tpu.memory_space<vmem>>, %arg6: memref<1x16xf32, #tpu.memory_space<vmem>>, %arg7: memref<1x16xf32, #tpu.memory_space<vmem>>, %arg8: memref<1x8x16xf32, #tpu.memory_space<vmem>>, %arg9: memref<1x8x24xbf16, #tpu.memory_space<vmem>>, %arg10: memref<1x10x16xf32, #tpu.memory_space<vmem>>, %arg11: memref<1x8x48xbf16, #tpu.memory_space<vmem>>) attributes {dimension_semantics = [#tpu.dimension_semantics<parallel>], iteration_bounds = array<i64: 2>, scalar_prefetch = 0 : i64, scratch_operands = 3 : i64, tpu.core_type = #tpu.core_type<tc>, window_params = [{transform_indices = @transform_0, window_bounds = array<i64: 1, 18, 8>}, {pipeline_mode = #tpu.pipeline_mode<synchronous>, transform_indices = @transform_1, window_bounds = array<i64: 24, 32>}, {pipeline_mode = #tpu.pipeline_mode<synchronous>, transform_indices = @transform_2, window_bounds = array<i64: 1, 32>}, {pipeline_mode = #tpu.pipeline_mode<synchronous>, transform_indices = @transform_3, window_bounds = array<i64: 1, 32>}, {pipeline_mode = #tpu.pipeline_mode<synchronous>, transform_indices = @transform_4, window_bounds = array<i64: 48, 16>}, {pipeline_mode = #tpu.pipeline_mode<synchronous>, transform_indices = @transform_5, window_bounds = array<i64: 1, 16>}, {pipeline_mode = #tpu.pipeline_mode<synchronous>, transform_indices = @transform_6, window_bounds = array<i64: 1, 16>}, {transform_indices = @transform_7, window_bounds = array<i64: 1, 8, 16>}]} {
    %c0 = arith.constant 0 : index
    %c0_0 = arith.constant 0 : index
    %c0_1 = arith.constant 0 : index
    %0 = tpu.strided_load %arg1[%c0, %c0_0, %c0_1] {strides = array<i32: 1, 2, 1>} : memref<1x18x8xf32, #tpu.memory_space<vmem>>, vector<1x8x8xf32>
    %1 = arith.truncf %0 : vector<1x8x8xf32> to vector<1x8x8xbf16>
    %c0_2 = arith.constant 0 : index
    %c0_3 = arith.constant 0 : index
    %c0_4 = arith.constant 0 : index
    %2 = vector.load %arg9[%c0_2, %c0_3, %c0_4] : memref<1x8x24xbf16, #tpu.memory_space<vmem>>, vector<1x8x8xbf16>
    tpu.vector_store %arg9[%c0_2, %c0_3, %c0_4], %1 {strides = array<i32>} : memref<1x8x24xbf16, #tpu.memory_space<vmem>>, vector<1x8x8xbf16>,
    %c0_5 = arith.constant 0 : index
    %c1 = arith.constant 1 : index
    %c0_6 = arith.constant 0 : index
    %3 = tpu.strided_load %arg1[%c0_5, %c1, %c0_6] {strides = array<i32: 1, 2, 1>} : memref<1x18x8xf32, #tpu.memory_space<vmem>>, vector<1x8x8xf32>
    %4 = arith.truncf %3 : vector<1x8x8xf32> to vector<1x8x8xbf16>
    %c0_7 = arith.constant 0 : index
    %c0_8 = arith.constant 0 : index
    %c8 = arith.constant 8 : index
    %5 = vector.load %arg9[%c0_7, %c0_8, %c8] : memref<1x8x24xbf16, #tpu.memory_space<vmem>>, vector<1x8x8xbf16>
    tpu.vector_store %arg9[%c0_7, %c0_8, %c8], %4 {strides = array<i32>} : memref<1x8x24xbf16, #tpu.memory_space<vmem>>, vector<1x8x8xbf16>,
    %c0_9 = arith.constant 0 : index
    %c2 = arith.constant 2 : index
    %c0_10 = arith.constant 0 : index
    %6 = tpu.strided_load %arg1[%c0_9, %c2, %c0_10] {strides = array<i32: 1, 2, 1>} : memref<1x18x8xf32, #tpu.memory_space<vmem>>, vector<1x8x8xf32>
    %7 = arith.truncf %6 : vector<1x8x8xf32> to vector<1x8x8xbf16>
    %c0_11 = arith.constant 0 : index
    %c0_12 = arith.constant 0 : index
    %c16 = arith.constant 16 : index
    %8 = vector.load %arg9[%c0_11, %c0_12, %c16] : memref<1x8x24xbf16, #tpu.memory_space<vmem>>, vector<1x8x8xbf16>
    tpu.vector_store %arg9[%c0_11, %c0_12, %c16], %7 {strides = array<i32>} : memref<1x8x24xbf16, #tpu.memory_space<vmem>>, vector<1x8x8xbf16>,
    %c0_13 = arith.constant 0 : index
    %c0_14 = arith.constant 0 : index
    %c0_15 = arith.constant 0 : index
    %9 = vector.load %arg9[%c0_13, %c0_14, %c0_15] : memref<1x8x24xbf16, #tpu.memory_space<vmem>>, vector<1x8x24xbf16>
    %10 = vector.shape_cast %9 : vector<1x8x24xbf16> to vector<8x24xbf16>
    %c0_16 = arith.constant 0 : index
    %c0_17 = arith.constant 0 : index
    %11 = vector.load %arg2[%c0_16, %c0_17] : memref<24x32xbf16, #tpu.memory_space<vmem>>, vector<24x32xbf16>
    %cst = arith.constant dense<0.000000e+00> : vector<8x32xf32>
    %12 = tpu.matmul %10, %11, %cst {dimension_numbers = #tpu.dot_dimension_numbers<[1], [0], [0], [1], [0, 0, 1, 1], [], []>} : vector<8x24xbf16>, vector<24x32xbf16>, vector<8x32xf32> -> vector<8x32xf32>
    %c0_18 = arith.constant 0 : index
    %c0_19 = arith.constant 0 : index
    %13 = vector.load %arg3[%c0_18, %c0_19] : memref<1x32xf32, #tpu.memory_space<vmem>>, vector<1x32xf32>
    %14 = vector.broadcast %13 : vector<1x32xf32> to vector<8x32xf32>
    %15 = arith.mulf %12, %14 : vector<8x32xf32>
    %c0_20 = arith.constant 0 : index
    %c0_21 = arith.constant 0 : index
    %16 = vector.load %arg4[%c0_20, %c0_21] : memref<1x32xf32, #tpu.memory_space<vmem>>, vector<1x32xf32>
    %17 = vector.broadcast %16 : vector<1x32xf32> to vector<8x32xf32>
    %18 = arith.addf %15, %17 : vector<8x32xf32>
    %19 = vector.extract_strided_slice %18 {offsets = [0, 0], sizes = [8, 16], strides = [1, 1]} : vector<8x32xf32> to vector<8x16xf32>
    %cst_22 = arith.constant 0.000000e+00 : f32
    %20 = vector.broadcast %cst_22 : f32 to vector<8x16xf32>
    %21 = arith.maximumf %19, %20 : vector<8x16xf32>
    %22 = vector.extract_strided_slice %18 {offsets = [0, 16], sizes = [8, 16], strides = [1, 1]} : vector<8x32xf32> to vector<8x16xf32>
    %cst_23 = arith.constant 0.000000e+00 : f32
    %23 = vector.broadcast %cst_23 : f32 to vector<1x1x16xf32>
    %c0_24 = arith.constant 0 : index
    %c0_25 = arith.constant 0 : index
    %c0_26 = arith.constant 0 : index
    %24 = vector.load %arg10[%c0_24, %c0_25, %c0_26] : memref<1x10x16xf32, #tpu.memory_space<vmem>>, vector<1x1x16xf32>
    tpu.vector_store %arg10[%c0_24, %c0_25, %c0_26], %23 {strides = array<i32>} : memref<1x10x16xf32, #tpu.memory_space<vmem>>, vector<1x1x16xf32>,
    %cst_27 = arith.constant 0.000000e+00 : f32
    %25 = vector.broadcast %cst_27 : f32 to vector<1x1x16xf32>
    %c0_28 = arith.constant 0 : index
    %c9 = arith.constant 9 : index
    %c0_29 = arith.constant 0 : index
    %26 = vector.load %arg10[%c0_28, %c9, %c0_29] : memref<1x10x16xf32, #tpu.memory_space<vmem>>, vector<1x1x16xf32>
    tpu.vector_store %arg10[%c0_28, %c9, %c0_29], %25 {strides = array<i32>} : memref<1x10x16xf32, #tpu.memory_space<vmem>>, vector<1x1x16xf32>,
    %27 = vector.shape_cast %21 : vector<8x16xf32> to vector<1x8x16xf32>
    %c0_30 = arith.constant 0 : index
    %c1_31 = arith.constant 1 : index
    %c0_32 = arith.constant 0 : index
    %28 = vector.load %arg10[%c0_30, %c1_31, %c0_32] : memref<1x10x16xf32, #tpu.memory_space<vmem>>, vector<1x8x16xf32>
    tpu.vector_store %arg10[%c0_30, %c1_31, %c0_32], %27 {strides = array<i32>} : memref<1x10x16xf32, #tpu.memory_space<vmem>>, vector<1x8x16xf32>,
    %c0_33 = arith.constant 0 : index
    %c0_34 = arith.constant 0 : index
    %c0_35 = arith.constant 0 : index
    %29 = vector.load %arg10[%c0_33, %c0_34, %c0_35] : memref<1x10x16xf32, #tpu.memory_space<vmem>>, vector<1x8x16xf32>
    %30 = arith.truncf %29 : vector<1x8x16xf32> to vector<1x8x16xbf16>
    %c0_36 = arith.constant 0 : index
    %c0_37 = arith.constant 0 : index
    %c0_38 = arith.constant 0 : index
    %31 = vector.load %arg11[%c0_36, %c0_37, %c0_38] : memref<1x8x48xbf16, #tpu.memory_space<vmem>>, vector<1x8x16xbf16>
    tpu.vector_store %arg11[%c0_36, %c0_37, %c0_38], %30 {strides = array<i32>} : memref<1x8x48xbf16, #tpu.memory_space<vmem>>, vector<1x8x16xbf16>,
    %c0_39 = arith.constant 0 : index
    %c1_40 = arith.constant 1 : index
    %c0_41 = arith.constant 0 : index
    %32 = vector.load %arg10[%c0_39, %c1_40, %c0_41] : memref<1x10x16xf32, #tpu.memory_space<vmem>>, vector<1x8x16xf32>
    %33 = arith.truncf %32 : vector<1x8x16xf32> to vector<1x8x16xbf16>
    %c0_42 = arith.constant 0 : index
    %c0_43 = arith.constant 0 : index
    %c16_44 = arith.constant 16 : index
    %34 = vector.load %arg11[%c0_42, %c0_43, %c16_44] : memref<1x8x48xbf16, #tpu.memory_space<vmem>>, vector<1x8x16xbf16>
    tpu.vector_store %arg11[%c0_42, %c0_43, %c16_44], %33 {strides = array<i32>} : memref<1x8x48xbf16, #tpu.memory_space<vmem>>, vector<1x8x16xbf16>,
    %c0_45 = arith.constant 0 : index
    %c2_46 = arith.constant 2 : index
    %c0_47 = arith.constant 0 : index
    %35 = vector.load %arg10[%c0_45, %c2_46, %c0_47] : memref<1x10x16xf32, #tpu.memory_space<vmem>>, vector<1x8x16xf32>
    %36 = arith.truncf %35 : vector<1x8x16xf32> to vector<1x8x16xbf16>
    %c0_48 = arith.constant 0 : index
    %c0_49 = arith.constant 0 : index
    %c32 = arith.constant 32 : index
    %37 = vector.load %arg11[%c0_48, %c0_49, %c32] : memref<1x8x48xbf16, #tpu.memory_space<vmem>>, vector<1x8x16xbf16>
    tpu.vector_store %arg11[%c0_48, %c0_49, %c32], %36 {strides = array<i32>} : memref<1x8x48xbf16, #tpu.memory_space<vmem>>, vector<1x8x16xbf16>,
    %c0_50 = arith.constant 0 : index
    %c0_51 = arith.constant 0 : index
    %c0_52 = arith.constant 0 : index
    %38 = vector.load %arg11[%c0_50, %c0_51, %c0_52] : memref<1x8x48xbf16, #tpu.memory_space<vmem>>, vector<1x8x48xbf16>
    %39 = vector.shape_cast %38 : vector<1x8x48xbf16> to vector<8x48xbf16>
    %c0_53 = arith.constant 0 : index
    %c0_54 = arith.constant 0 : index
    %40 = vector.load %arg5[%c0_53, %c0_54] : memref<48x16xbf16, #tpu.memory_space<vmem>>, vector<48x16xbf16>
    %cst_55 = arith.constant dense<0.000000e+00> : vector<8x16xf32>
    %41 = tpu.matmul %39, %40, %cst_55 {dimension_numbers = #tpu.dot_dimension_numbers<[1], [0], [0], [1], [0, 0, 1, 1], [], []>} : vector<8x48xbf16>, vector<48x16xbf16>, vector<8x16xf32> -> vector<8x16xf32>
    %c0_56 = arith.constant 0 : index
    %c0_57 = arith.constant 0 : index
    %42 = vector.load %arg6[%c0_56, %c0_57] : memref<1x16xf32, #tpu.memory_space<vmem>>, vector<1x16xf32>
    %43 = vector.broadcast %42 : vector<1x16xf32> to vector<8x16xf32>
    %44 = arith.mulf %41, %43 : vector<8x16xf32>
    %c0_58 = arith.constant 0 : index
    %c0_59 = arith.constant 0 : index
    %45 = vector.load %arg7[%c0_58, %c0_59] : memref<1x16xf32, #tpu.memory_space<vmem>>, vector<1x16xf32>
    %46 = vector.broadcast %45 : vector<1x16xf32> to vector<8x16xf32>
    %47 = arith.addf %44, %46 : vector<8x16xf32>
    %48 = arith.addf %47, %22 : vector<8x16xf32>
    %cst_60 = arith.constant 0.000000e+00 : f32
    %49 = vector.broadcast %cst_60 : f32 to vector<8x16xf32>
    %50 = arith.maximumf %48, %49 : vector<8x16xf32>
    %51 = vector.shape_cast %50 : vector<8x16xf32> to vector<1x8x16xf32>
    %c0_61 = arith.constant 0 : index
    %c0_62 = arith.constant 0 : index
    %c0_63 = arith.constant 0 : index
    %52 = vector.load %arg8[%c0_61, %c0_62, %c0_63] : memref<1x8x16xf32, #tpu.memory_space<vmem>>, vector<1x8x16xf32>
    tpu.vector_store %arg8[%c0_61, %c0_62, %c0_63], %51 {strides = array<i32>} : memref<1x8x16xf32, #tpu.memory_space<vmem>>, vector<1x8x16xf32>,
    return
  }
  func.func @transform_0(%arg0: i32) -> (i32, i32, i32) {
    %c0_i32 = arith.constant 0 : i32
    %c0_i32_0 = arith.constant 0 : i32
    %c0_i32_1 = arith.constant 0 : i32
    return %arg0, %c0_i32, %c0_i32_0 : i32, i32, i32
  }
  func.func @transform_1(%arg0: i32) -> (i32, i32) {
    %c0_i32 = arith.constant 0 : i32
    %c0_i32_0 = arith.constant 0 : i32
    %c0_i32_1 = arith.constant 0 : i32
    return %c0_i32, %c0_i32_0 : i32, i32
  }
  func.func @transform_2(%arg0: i32) -> (i32, i32) {
    %c0_i32 = arith.constant 0 : i32
    %c0_i32_0 = arith.constant 0 : i32
    %c0_i32_1 = arith.constant 0 : i32
    return %c0_i32, %c0_i32_0 : i32, i32
  }
  func.func @transform_3(%arg0: i32) -> (i32, i32) {
    %c0_i32 = arith.constant 0 : i32
    %c0_i32_0 = arith.constant 0 : i32
    %c0_i32_1 = arith.constant 0 : i32
    return %c0_i32, %c0_i32_0 : i32, i32
  }
  func.func @transform_4(%arg0: i32) -> (i32, i32) {
    %c0_i32 = arith.constant 0 : i32
    %c0_i32_0 = arith.constant 0 : i32
    %c0_i32_1 = arith.constant 0 : i32
    return %c0_i32, %c0_i32_0 : i32, i32
  }
  func.func @transform_5(%arg0: i32) -> (i32, i32) {
    %c0_i32 = arith.constant 0 : i32
    %c0_i32_0 = arith.constant 0 : i32
    %c0_i32_1 = arith.constant 0 : i32
    return %c0_i32, %c0_i32_0 : i32, i32
  }
  func.func @transform_6(%arg0: i32) -> (i32, i32) {
    %c0_i32 = arith.constant 0 : i32
    %c0_i32_0 = arith.constant 0 : i32
    %c0_i32_1 = arith.constant 0 : i32
    return %c0_i32, %c0_i32_0 : i32, i32
  }
  func.func @transform_7(%arg0: i32) -> (i32, i32, i32) {
    %c0_i32 = arith.constant 0 : i32
    %c0_i32_0 = arith.constant 0 : i32
    %c0_i32_1 = arith.constant 0 : i32
    return %arg0, %c0_i32, %c0_i32_0 : i32, i32, i32
  }
}

</mosaic_0001>

<bundles_post_ra>
// kernel: tpu_custom_call.1
= control target key start
LH: loop header
LB: loop body
LE: loop exit
PB: predicated region body
PF: predicated region fallthrough
CT: control target
= control target key end

     0   :  { %12 = vsyncpa [#allocation6], 0  ;;  %s925_s0 = inlined_call_operand.vmem [shape: f32[2,18,8], index: 0, kind: input, shape index: {}]   ;;  %s926_s1 = inlined_call_operand.vmem [shape: bf16[24,32], index: 1, kind: input, shape index: {}]   ;;  %s927_s2 = inlined_call_operand.vmem [shape: f32[1,32], index: 2, kind: input, shape index: {}]   ;;  %s928_s3 = inlined_call_operand.vmem [shape: f32[1,32], index: 3, kind: input, shape index: {}]   ;;  %s929_s4 = inlined_call_operand.vmem [shape: bf16[48,16], index: 4, kind: input, shape index: {}]   ;;  %s930_s5 = inlined_call_operand.vmem [shape: f32[1,16], index: 5, kind: input, shape index: {}]   ;;  %s931_s6 = inlined_call_operand.vmem [shape: f32[1,16], index: 6, kind: input, shape index: {}]   ;;  %s932_s7 = inlined_call_operand.hbm [shape: f32[2,8,16], index: 7, kind: output, shape index: {}]  }
   0x1   :  { %14 = vsyncpa [#allocation6 + $0x1], 0  ;;  %s794_s24 = smov 0   ;;  %s796_s25 = smov 0  }
   0x2   :  { %s798_s26 = smov 0   ;;  %s800_s27 = smov 0  }
   0x3 LB: > { %s815_s28 = sadd.s32 4294967295, %s745_s27   ;;  %s576_s29 = sadd.s32 4294967294, %s745_s27   ;;  %s745_s27 = sphi %s800_s27, %s938_s27   ;;  %s741_s26 = sphi %s798_s26, %s937_s26   ;;  %s737_s25 = sphi %s796_s25, %s936_s25   ;;  %s733_s24 = sphi %s794_s24, %s935_s24  }
   0x4   : > { %s819_s30 = sadd.s32 1, %s745_s27   ;;  %s179_s8 = sadd.s32 1, %s741_s26 }
   0x5   : > { %s176_s9 = ssub.s32 %s745_s27, %s819_s30  ;;  %p189_p0 = scmp.ne.s32.totalorder %s741_s26, %s737_s25 }
   0x6   : > { %p177_p1 = scmp.eq.s32.totalorder %s176_s9, 0  ;;  %p190_p2 = scmp.eq.s32.totalorder %s815_s28, 1 }
   0x7   : > { %p195_p3 = scmp.ne.s32.totalorder %s737_s25, %s733_s24  ;;  %p196_p4 = scmp.eq.s32.totalorder %s576_s29, 1 }
   0x8   : > { %s830_s10 = scalar_select %p177_p1, %s741_s26, %s179_s8  }
   0x9   : > { %p832_p5 = por %p190_p2, %p189_p0  ;;  %p836_p6 = por %p196_p4, %p195_p3 }
   0xa   : > { %p579_p7 = scmp.ge.s32.totalorder %s745_s27, 1  ;;  %p240_p8 = scmp.lt.s32.totalorder %s745_s27, 3 }
   0xc   : > { %p241_p9 = pnand %p579_p7, %p240_p8 }
   0xd   : > { %p272_p10 = scmp.lt.s32.totalorder (!%p241_p9), %s815_s28, 1  ;;  %v747_v0 = vmov (!%p241_p9), 0.0   ;;  %v678_v1 = vld [vmem:[%s926_s1] sm:$0xff] (!%p241_p9)   ;;  %v679_v2 = vld [vmem:[%s926_s1 + $0x8] ss:$0 sps:$4 sm:$0xff] (!%p241_p9)   ;;  %vm321_vm0 = vcmask (!%p241_p9), 1043456  }
   0xe   : > { %244 = sbr.rel (%p241_p9) target bundleno = 745 (0x2e9), region = 48  ;;  %614 = vmatprep.subr.bf16.mxu0 (!%p241_p9), %v747_v0  ;;  %622 = vmatprep.subr.bf16.mxu1 (!%p241_p9), %v747_v0  ;;  %v323_v3 = vsel (!%p241_p9), %vm321_vm0, %v679_v2, 0  ;;  %vm748_vm1 = vmmov (!%p241_p9), 0   ;;  %vm280_vm2 = vcmask (!%p241_p9), 60416   ;;  %s749_s22 = smov (!%p241_p9), 8   ;;  %vm291_vm3 = vcmask (!%p241_p9), 126016  }
   0xf   : > { %615 = vmatpush3.bf16.msra.mxu0 (!%p241_p9), %v678_v1  ;;  %618 = vmatprep.mubr.msk.bf16.mxu0 (!%p241_p9), %vm748_vm1, %v747_v0  ;;  %s750_s23 = smov (!%p241_p9), 16   ;;  %vm302_vm4 = vcmask (!%p241_p9), 191616   ;;  %vm317_vm5 = vcmask (!%p241_p9), 195584   ;;  %vm382_vm6 = vcmask (!%p241_p9), 122880   ;;  %v589_v13 = vld [vmem:[%s927_s2] ss:$0 sm:$0xff] (!%p241_p9) }
  0x10   : > { %616 = vmatprep.subr.bf16.mxu0 (!%p241_p9), %v747_v0  ;;  %628 = vmatprep.mubr.msk.bf16.mxu1 (!%p241_p9), %vm748_vm1, %v747_v0  ;;  %384 = vst.msk [vmem:[#allocation3 + $0x9] sm:$0x1] (!%p241_p9), %vm382_vm6, %v747_v0  ;;  %383 = vst.msk [vmem:[#allocation3] sm:$0x1] (!%p241_p9), %vm382_vm6, %v747_v0  ;;  %v590_v15 = vld [vmem:[%s928_s3] ss:$0 sm:$0xff] (!%p241_p9) }
  0x11   : > { %v680_v21 = vld [vmem:[%s929_s4] sm:$0xff] (!%p241_p9)   ;;  %vm385_vm7 = vcmask (!%p241_p9), 130048   ;;  %s751_s16 = smov (!%p241_p9), 112   ;;  %v681_v23 = vld [vmem:[%s929_s4 + $0x8] sm:$0xff] (!%p241_p9)   ;;  %v682_v24 = vld [vmem:[%s929_s4 + $0x10] sm:$0xff] (!%p241_p9)   ;;  %vm389_vm8 = vcmask (!%p241_p9), 125952  }
  0x12   : > { %623 = vmatpush3.bf16.msra.mxu1 (!%p241_p9), %v680_v21  ;;  %vm399_vm9 = vcmask (!%p241_p9), 257152   ;;  %vm409_vm10 = vcmask (!%p241_p9), 388352   ;;  %vm436_vm11 = vcmask (!%p241_p9), 392192   ;;  %v597_v34 = vld [vmem:[%s930_s5] ss:$0 sm:$0xff] (!%p241_p9)  ;;  %s600_s14 = sshll.u32 (!%p241_p9), %s815_s28, 7 }
  0x13   : > { %617 = vmatpush3.bf16.msra.mxu0 (!%p241_p9), %v323_v3  ;;  %624 = vmatprep.subr.bf16.mxu1 (!%p241_p9), %v747_v0  ;;  %v598_v36 = vld [vmem:[%s931_s6] ss:$0 sm:$0xff] (!%p241_p9)  ;;  %s882_s19 = scalar_lea.hbm (!%p241_p9), %s932_s7, %s600_s14 }
  0x15   : > { %s273_s15 = scalar_select %p272_p10, %s815_s28, 1 }
  0x16   : > { %625 = vmatpush3.bf16.msra.mxu1 %v681_v23  ;;  %s753_s28 = smov [#allocation5]  }
  0x17   : > { %s632_s18 = smul.u32 24, %s273_s15  ;;  %626 = vmatprep.subr.bf16.mxu1 %v747_v0  ;;  %s687_s29 = sshll.u32 %s753_s28, 4  ;;  %s688_s29 = int_to_ptr.vmem [resolvable:$false] %s687_s29 }
  0x18   : > { %s689_s8 = scalar_lea.vmem %s688_s29, 256 }
  0x19   : > { %s276_s21 = scalar_lea.vmem %s925_s0, %s632_s18 }
  0x1a   : > { %v582_v4 = vld [vmem:[%s276_s21 + $0x1] ss:$2 sm:$0xff]  ;;  %v584_v5 = vld [vmem:[%s276_s21 + $0x2] ss:$2 sm:$0xff]  ;;  %627 = vmatpush3.bf16.msra.mxu1 %v682_v24 }
  0x1b   : > { %v278_v6 = vld [vmem:[%s276_s21] ss:$2 sm:$0xff]  ;;  %v603_v7 = vpack.c.bf16 %v582_v4, %v582_v4  ;;  %v604_v9 = vpack.c.bf16 %v584_v5, %v584_v5  ;;  %s752_s21 = smov 32  }
  0x1c   : > { %v279_v8 = vpack.c.bf16 %v278_v6, %v278_v6 }
  0x1d   : > { %288 = vrot.lane.b32.xlu0 %v603_v7, %s749_s22  ;;  %s269_s22 = sand.u32 1, %s737_s25  }
  0x1e   : > { %281 = vst.msk [vmem:[#allocation2] sm:$0xf] %vm280_vm2, %v279_v8  ;;  %s504_s20 = scalar_lea.sflag [#allocation6], %s269_s22 }
  0x21   : > { %299 = vrot.lane.b32.xlu0 %v604_v9, %s750_s23 }
  0x8f   : > { %v289_v10 = vpop.permute.xlu0 %288 }
  0x90   : > { %292 = vst.msk [vmem:[#allocation2] sm:$0xf] %vm291_vm3, %v289_v10 }
  0x93   : > { %v300_v11 = vpop.permute.xlu0 %299 }
  0x94   : > { %303 = vst.msk [vmem:[#allocation2] sm:$0xf] %vm302_vm4, %v300_v11 }
  0x9b   : > { %v304_v12 = vld [vmem:[#allocation2] sm:$0xf] }
  0x9c   : > { %619 = vmatmul.mubr.msk.bf16.vlgmr.msra.gmra.mrb[0].mxu0 %vm317_vm5, %v304_v12 }
 0x16f   : > { %v359_v14 = vpop.f32.mrb[0].mxu0 }
 0x170   : > { %v372_v16 = vmul.f32 %v589_v13, %v359_v14  ;;  %v620_v17 = vpop.f32.mrb[1].mxu0 }
 0x171   : > { %v362_v18 = vpop.f32.mrb[2].mxu0 }
 0x172   : > { %v380_v19 = vadd.f32 %v590_v15, %v372_v16  ;;  %v621_v20 = vpop.f32.mrb[3].mxu0 }
 0x174   : > { %v381_v22 = vmax.f32 %v380_v19, 0.0  ;;  %497 = vrot.lane.b32.xlu0 %v380_v19, %s751_s16 }
 0x176   : > { %386 = vst.msk [vmem:[#allocation3 + $0x1] sm:$0xff] %vm385_vm7, %v381_v22 }
 0x17d   : > { %v391_v25 = vld [vmem:[#allocation3 + $0x1] sm:$0xff] }
 0x17e   : > { %v387_v26 = vld [vmem:[#allocation3] sm:$0xff]  ;;  %v605_v27 = vpack.c.bf16 %v391_v25, %v391_v25 }
 0x17f   : > { %v388_v28 = vpack.c.bf16 %v387_v26, %v387_v26  ;;  %v401_v29 = vld [vmem:[#allocation3 + $0x2] sm:$0xff] }
 0x180   : > { %396 = vrot.lane.b32.xlu1 %v605_v27, %s750_s23  ;;  %v606_v30 = vpack.c.bf16 %v401_v29, %v401_v29  ;;  %s580_s23 = sshll.u32 %s269_s22, 3 }
 0x181   : > { %390 = vst.msk [vmem:[#allocation4] sm:$0xf] %vm389_vm8, %v388_v28  ;;  %s271_s15 = scalar_lea.vmem [#allocation5], %s580_s23 }
 0x182   : > { %s517_s16 = sshll.u32 %s271_s15, 4  ;;  %s884_s16 = int_to_ptr.vmem [resolvable:$true] %s517_s16 }
 0x183   : > { %p690_p0 = scmp.lt.s32.totalorder %s884_s16, %s688_s29 }
 0x184   : > { %406 = vrot.lane.b32.xlu1 %v606_v30, %s752_s21  ;;  %s683_s21 = scalar_lea.vmem %s884_s16, 128 }
 0x185   : > { %p684_p11 = scmp.ne.s32.totalorder %s884_s16, %s683_s21  ;;  %p691_p1 = scmp.lt.s32.totalorder %s689_s8, %s683_s21 }
 0x187   : > { %p685_p12 = pnand %p684_p11, %p832_p5  ;;  %p692_p2 = por %p691_p1, %p690_p0 }
 0x189   : > { %p686_p13 = pneg %p685_p12 }
 0x18b   : > { %p693_p3 = pnand %p692_p2, %p686_p13 }
 0x1e6   : > { %v498_v42 = vpop.permute.xlu0 %497 }
 0x1f2   : > { %v397_v31 = vpop.permute.xlu1 %396 }
 0x1f3   : > { %400 = vst.msk [vmem:[#allocation4] sm:$0xf] %vm399_vm9, %v397_v31 }
 0x1f6   : > { %v407_v32 = vpop.permute.xlu1 %406 }
 0x1f7   : > { %410 = vst.msk [vmem:[#allocation4] sm:$0xf] %vm409_vm10, %v407_v32 }
 0x1fe   : > { %v411_v33 = vld [vmem:[#allocation4] sm:$0xf] }
 0x1ff   : > { %629 = vmatmul.mubr.msk.bf16.vlgmr.msra.gmra.mrb[0].mxu1 %vm436_vm11, %v411_v33 }
 0x2d2   : > { %v474_v35 = vpop.f32.mrb[0].mxu1 }
 0x2d3   : > { %v487_v37 = vmul.f32 %v597_v34, %v474_v35  ;;  %v630_v38 = vpop.f32.mrb[1].mxu1 }
 0x2d4   : > { %v477_v39 = vpop.f32.mrb[2].mxu1 }
 0x2d5   : > { %v495_v40 = vadd.f32 %v598_v36, %v487_v37  ;;  %v631_v41 = vpop.f32.mrb[3].mxu1 }
 0x2d7   : > { %v500_v43 = vadd.f32 %v498_v42, %v495_v40 }
 0x2d9   : > { %v501_v44 = vmax.f32 %v500_v43, 0.0 }
 0x2db   : > { %502 = vst.msk [vmem:[%s271_s15] sm:$0xff] %vm385_vm7, %v501_v44 }
 0x2dc   : > { %696 = shalt.err (!%p693_p3)
}
 0x2dd   : > { %s697_s22 = scalar_lea.hbm %s882_s19, 128  ;;  %s701_s13 = scalar_lea.hbm %s932_s7, 256 }
 0x2de   : > { %p698_p4 = scmp.ne.s32.totalorder %s882_s19, %s697_s22  ;;  %p702_p9 = scmp.lt.u32.totalorder %s882_s19, %s932_s7 }
 0x2df   : > { %p703_p10 = scmp.lt.u32.totalorder %s701_s13, %s697_s22  ;;  %p705_p12 = scmp.lt.u32.totalorder %s697_s22, %s882_s19 }
 0x2e0   : > { %p699_p7 = pnand %p698_p4, %p832_p5 }
 0x2e1   : > { %p704_p11 = por %p703_p10, %p702_p9 }
 0x2e2   : > { %p700_p8 = pneg %p699_p7 }
 0x2e3   : > { %p706_p13 = por %p705_p12, %p704_p11 }
 0x2e5   : > { %p707_p0 = pnand %p706_p13, %p700_p8 }
 0x2e7   : > { %710 = shalt.err (!%p707_p0)
}
 0x2e8   : > { %633 = dma.vmem_to_hbm [thread:$0]  (%p832_p5), %s884_s16, 128, %s882_s19, %s504_s20  }
 0x2e9 PF: > { %p639_p1 = scmp.ge.s32.totalorder %s745_s27, 2  ;;  %s529_s17 = sand.u32 1, %s733_s24  }
 0x2ea   : > { %s530_s18 = scalar_lea.sflag [#allocation6], %s529_s17 }
 0x2eb   : > { %p636_p2 = pnand %p639_p1, %p836_p6 }
 0x2ed   : > { %728 = dma.done.wait (!%p636_p2), %s530_s18, 128  }
 0x2ee   : > { %730 = vsyncadd (!%p636_p2), %s530_s18, 4294967168  ;;  %p17_p3 = scmp.ge.s32.totalorder %s819_s30, 4   ;;  %s935_s24 = smov %s737_s25 }
 0x2ef   : > { %s936_s25 = smov %s741_s26  ;;  %s937_s26 = smov %s830_s10 }
 0x2f0   : > { %s938_s27 = smov %s819_s30  ;;  %19 = sbr.rel (!%p17_p3) target bundleno = 3 (0x3), region = 85 }
 0x2f7   :  { %535 = vsyncpa [#allocation6], 1 }
 0x2f8   :  { %537 = vsyncpa [#allocation6 + $0x1], 1 }

</bundles_post_ra>
